<compile_context>
chip_gen: v5e
topology: v5e:2x2
jax: 0.10.0
libtpu: 0.0.40
codegen_flags: <defaults>
</compile_context>

<pallas_src>
import functools

import jax
import jax.numpy as jnp
from jax.experimental import pallas as pl
from jax.experimental.pallas import tpu as pltpu


def _round_up(v, m):
    return (v + m - 1) // m * m


# ---------------------------------------------------------------------------
# Fused kernel: whole MLP on one row-tile
# ---------------------------------------------------------------------------
def _fused_mlp_kernel(x_ref, b_ref, *rest, layer_num, skips, out_pads):
    """rest = (w0_ref, w1_ref, ..., w_{L-1}_ref, o_ref)."""
    o_ref = rest[-1]
    w_refs = rest[:layer_num]

    # Activations stay resident in the compute dtype (bf16 by default) between
    # layers; the MXU accumulates in f32 and the bias/skip/ReLU epilogue plus
    # the skip source and final store are f32.
    h = x_ref[...]                                   # [tile_n, in_pad], compute dtype
    skip_f32 = h.astype(jnp.float32)
    b_all = b_ref[...]                               # [L, out_max] f32, VMEM resident

    for i in range(layer_num):
        last = i == layer_num - 1
        w = w_refs[i][...]                           # [in_pad_i, out_pad_i]
        # MXU matmul, f32 accumulation.
        y = jnp.dot(h, w, preferred_element_type=jnp.float32)
        y = y + b_all[i:i + 1, :out_pads[i]]         # static lane-aligned slice
        if skips is not None and i in skips:
            y = y + skip_f32
            if not last:
                y = jnp.maximum(y, 0.0)
            skip_f32 = y
        elif not last:
            y = jnp.maximum(y, 0.0)
        if last:
            # Single lane-dense store per row tile.
            o_ref[...] = y.astype(o_ref.dtype)
        else:
            h = y.astype(w.dtype)                    # back to compute dtype


def _resident_spec(shape):
    """Full-array, grid-invariant, single-buffered (weights / packed biases)."""
    nd = len(shape)
    return pl.BlockSpec(shape, lambda i, _nd=nd: (0,) * _nd,
                        pipeline_mode=pl.Buffered(1))


# ---------------------------------------------------------------------------
# Wrapper: one pallas_call for the whole MLP, tiled over rows
# ---------------------------------------------------------------------------
def mlp_forward(x, params, layer_num, skips, *,
                tile_n=512,
                compute_dtype=jnp.bfloat16,
                lane_multiple=128,
                vmem_budget_bytes=48 * 1024 * 1024):
    """x: [N, in_features]; params[i] = (W_i [in_ch, out_ch], b_i [out_ch])."""
    n_rows, in_features = x.shape
    out_features = params[-1][0].shape[1]
    skips_t = tuple(skips) if skips is not None else None
    act_itemsize = jnp.dtype(compute_dtype).itemsize
    out_itemsize = x.dtype.itemsize

    # --- Lane-pad every feature dim to a multiple of `lane_multiple` --------
    in_pad = _round_up(in_features, lane_multiple)
    padded_w, out_pads, dims = [], [], [in_pad]
    weight_bytes = 0
    for (w, b) in params:
        ic, oc = w.shape
        icp, ocp = _round_up(ic, lane_multiple), _round_up(oc, lane_multiple)
        wp = jnp.pad(w.astype(compute_dtype), ((0, icp - ic), (0, ocp - oc)))
        padded_w.append(wp)
        out_pads.append(ocp)
        dims.append(ocp)
        weight_bytes += icp * ocp * act_itemsize
    out_max = max(out_pads)
    out_last = out_pads[-1]
    b_packed = jnp.stack(
        [jnp.pad(b.astype(jnp.float32), (0, out_max - b.shape[0]))
         for (_, b) in params], axis=0)                      # [L, out_max] f32

    x_p = x
    if in_pad != in_features:
        x_p = jnp.pad(x, ((0, 0), (0, in_pad - in_features)))
    x_p = x_p.astype(compute_dtype)

    # --- Derive tile_n against an explicit VMEM budget ----------------------
    maxdim = max(dims)
    per_row = (2 * in_pad * act_itemsize          # double-buffered input tile
               + 2 * out_last * out_itemsize      # double-buffered output tile
               + 3 * maxdim * 4)                  # live f32 temps (y, skip, bias bcast)
    avail = max(vmem_budget_bytes - weight_bytes - b_packed.size * 4,
                per_row * 8)
    cap = max(8, (avail // per_row) // 8 * 8)
    tile = min(tile_n, cap)
    if n_rows > 8:
        # Guarantee >= 2 row tiles so the "parallel" axis can shard across
        # the two v7x TensorCores (single-tile grids leave half the chip idle).
        tile = min(tile, _round_up(-(-n_rows // 2), 8))
    tile = max(8, min(_round_up(tile, 8), _round_up(n_rows, 8)))
    grid = (pl.cdiv(n_rows, tile),)

    # --- Specs / cost / VMEM limit ------------------------------------------
    in_specs = [pl.BlockSpec((tile, in_pad), lambda i: (i, 0)),
                _resident_spec(b_packed.shape)]
    in_specs += [_resident_spec(w.shape) for w in padded_w]

    flops = sum(2 * n_rows * w.shape[0] * w.shape[1] for w in padded_w)
    bytes_accessed = (x_p.size * act_itemsize
                      + n_rows * out_last * out_itemsize
                      + weight_bytes + b_packed.size * 4)
    vmem_est = (weight_bytes + 2 * b_packed.size * 4 + per_row * tile
                + (4 << 20))
    vmem_limit = int(min(128 << 20, max(vmem_est, 32 << 20)))

    kernel = functools.partial(
        _fused_mlp_kernel,
        layer_num=layer_num,
        skips=skips_t,
        out_pads=tuple(out_pads),
    )

    out = pl.pallas_call(
        kernel,
        out_shape=jax.ShapeDtypeStruct((n_rows, out_last), x.dtype),
        grid=grid,
        in_specs=in_specs,
        out_specs=pl.BlockSpec((tile, out_last), lambda i: (i, 0)),
        compiler_params=pltpu.CompilerParams(
            dimension_semantics=("parallel",),       # megacore on v7x
            vmem_limit_bytes=vmem_limit),
        cost_estimate=pl.CostEstimate(
            flops=flops, transcendentals=0, bytes_accessed=bytes_accessed),
    )(x_p, b_packed, *padded_w)

    if out_last != out_features:
        out = out[:, :out_features]
    return out


# ---------------------------------------------------------------------------
# Deterministic parameter init (PyTorch nn.Linear default: U(-k, k), k=1/sqrt(fan_in))
# ---------------------------------------------------------------------------
def init_mlp_params(key, in_features, hidden_features, out_features, layer_num):
    params = []
    for i in range(layer_num):
        in_ch = in_features if i == 0 else hidden_features
        out_ch = out_features if i == layer_num - 1 else hidden_features
        key, kw, kb = jax.random.split(key, 3)
        bound = 1.0 / (in_ch ** 0.5)
        # stored transposed: [in_ch, out_ch]
        w = jax.random.uniform(kw, (in_ch, out_ch), jnp.float32, -bound, bound)
        b = jax.random.uniform(kb, (out_ch,), jnp.float32, -bound, bound)
        params.append((w, b))
    return params


# ---------------------------------------------------------------------------
# Pure-JAX reference (same semantics as the PyTorch module) for verification
# ---------------------------------------------------------------------------
def mlp_reference(x, params, layer_num, skips):
    h = x
    for i in range(layer_num):
        w, b = params[i]
        h = h @ w + b
        if skips is not None:
            if i in skips:
                h = h + x
                if i < layer_num - 1:
                    h = jnp.maximum(h, 0.0)
                x = h
            elif i < layer_num - 1:
                h = jnp.maximum(h, 0.0)
        elif i < layer_num - 1:
            h = jnp.maximum(h, 0.0)
    return h


if __name__ == "__main__":
    # Small NeRF-style MLP: skip connection requires in_features == hidden_features.
    N = 64
    in_features = 32
    hidden_features = 32
    out_features = 16
    layer_num = 4
    skips = (2,)

    key = jax.random.PRNGKey(0)
    key, kx = jax.random.split(key)
    x = jax.random.normal(kx, (N, in_features), jnp.float32)

    params = init_mlp_params(key, in_features, hidden_features, out_features, layer_num)
    ref = mlp_reference(x, params, layer_num, skips)

    # Default bf16 MXU path (weights/activations bf16, f32 accumulate + epilogue).
    # tile_n derivation clamps to 32 rows -> grid=(2,), exercising row tiling,
    # pipelining and the >=2-tile megacore rule.
    out_bf16 = mlp_forward(x, params, layer_num, skips)
    out_bf16 = jax.block_until_ready(out_bf16)
    assert out_bf16.shape == (N, out_features)
    assert jnp.allclose(out_bf16, ref, atol=1e-1, rtol=1e-1), "bf16 mismatch vs reference"

    # Exact f32 path for numerical verification.
    out_f32 = mlp_forward(x, params, layer_num, skips, compute_dtype=jnp.float32)
    out_f32 = jax.block_until_ready(out_f32)
    assert out_f32.shape == (N, out_features)
    assert jnp.allclose(out_f32, ref, atol=1e-5, rtol=1e-5), "f32 mismatch vs reference"

    print("KERNEL_OK")
</pallas_src>

<mosaic_0001>
module attributes {stable_mosaic.version = 11 : i64} {
  func.func @_fused_mlp_kernel(%arg0: i32, %arg1: memref<32x128xbf16, #tpu.memory_space<vmem>>, %arg2: memref<4x128xf32, #tpu.memory_space<vmem>>, %arg3: memref<128x128xbf16, #tpu.memory_space<vmem>>, %arg4: memref<128x128xbf16, #tpu.memory_space<vmem>>, %arg5: memref<128x128xbf16, #tpu.memory_space<vmem>>, %arg6: memref<128x128xbf16, #tpu.memory_space<vmem>>, %arg7: memref<32x128xf32, #tpu.memory_space<vmem>>) attributes {dimension_semantics = [#tpu.dimension_semantics<parallel>], iteration_bounds = array<i64: 2>, scalar_prefetch = 0 : i64, scratch_operands = 0 : i64, tpu.core_type = #tpu.core_type<tc>, window_params = [{transform_indices = @transform_0, window_bounds = array<i64: 32, 128>}, {pipeline_mode = #tpu.pipeline_mode<synchronous>, transform_indices = @transform_1, window_bounds = array<i64: 4, 128>}, {pipeline_mode = #tpu.pipeline_mode<synchronous>, transform_indices = @transform_2, window_bounds = array<i64: 128, 128>}, {pipeline_mode = #tpu.pipeline_mode<synchronous>, transform_indices = @transform_3, window_bounds = array<i64: 128, 128>}, {pipeline_mode = #tpu.pipeline_mode<synchronous>, transform_indices = @transform_4, window_bounds = array<i64: 128, 128>}, {pipeline_mode = #tpu.pipeline_mode<synchronous>, transform_indices = @transform_5, window_bounds = array<i64: 128, 128>}, {transform_indices = @transform_6, window_bounds = array<i64: 32, 128>}]} {
    %c0 = arith.constant 0 : index
    %c0_0 = arith.constant 0 : index
    %0 = vector.load %arg1[%c0, %c0_0] : memref<32x128xbf16, #tpu.memory_space<vmem>>, vector<32x128xbf16>
    %1 = arith.extf %0 : vector<32x128xbf16> to vector<32x128xf32>
    %c0_1 = arith.constant 0 : index
    %c0_2 = arith.constant 0 : index
    %2 = vector.load %arg2[%c0_1, %c0_2] : memref<4x128xf32, #tpu.memory_space<vmem>>, vector<4x128xf32>
    %c0_3 = arith.constant 0 : index
    %c0_4 = arith.constant 0 : index
    %3 = vector.load %arg3[%c0_3, %c0_4] : memref<128x128xbf16, #tpu.memory_space<vmem>>, vector<128x128xbf16>
    %cst = arith.constant dense<0.000000e+00> : vector<32x128xf32>
    %4 = tpu.matmul %0, %3, %cst {dimension_numbers = #tpu.dot_dimension_numbers<[1], [0], [0], [1], [0, 0, 1, 1], [], []>} : vector<32x128xbf16>, vector<128x128xbf16>, vector<32x128xf32> -> vector<32x128xf32>
    %5 = vector.extract_strided_slice %2 {offsets = [0, 0], sizes = [1, 128], strides = [1, 1]} : vector<4x128xf32> to vector<1x128xf32>
    %6 = vector.broadcast %5 : vector<1x128xf32> to vector<32x128xf32>
    %7 = arith.addf %4, %6 : vector<32x128xf32>
    %cst_5 = arith.constant 0.000000e+00 : f32
    %8 = vector.broadcast %cst_5 : f32 to vector<32x128xf32>
    %9 = arith.maximumf %7, %8 : vector<32x128xf32>
    %10 = arith.truncf %9 : vector<32x128xf32> to vector<32x128xbf16>
    %c0_6 = arith.constant 0 : index
    %c0_7 = arith.constant 0 : index
    %11 = vector.load %arg4[%c0_6, %c0_7] : memref<128x128xbf16, #tpu.memory_space<vmem>>, vector<128x128xbf16>
    %cst_8 = arith.constant dense<0.000000e+00> : vector<32x128xf32>
    %12 = tpu.matmul %10, %11, %cst_8 {dimension_numbers = #tpu.dot_dimension_numbers<[1], [0], [0], [1], [0, 0, 1, 1], [], []>} : vector<32x128xbf16>, vector<128x128xbf16>, vector<32x128xf32> -> vector<32x128xf32>
    %13 = vector.extract_strided_slice %2 {offsets = [1, 0], sizes = [1, 128], strides = [1, 1]} : vector<4x128xf32> to vector<1x128xf32>
    %14 = vector.broadcast %13 : vector<1x128xf32> to vector<32x128xf32>
    %15 = arith.addf %12, %14 : vector<32x128xf32>
    %cst_9 = arith.constant 0.000000e+00 : f32
    %16 = vector.broadcast %cst_9 : f32 to vector<32x128xf32>
    %17 = arith.maximumf %15, %16 : vector<32x128xf32>
    %18 = arith.truncf %17 : vector<32x128xf32> to vector<32x128xbf16>
    %c0_10 = arith.constant 0 : index
    %c0_11 = arith.constant 0 : index
    %19 = vector.load %arg5[%c0_10, %c0_11] : memref<128x128xbf16, #tpu.memory_space<vmem>>, vector<128x128xbf16>
    %cst_12 = arith.constant dense<0.000000e+00> : vector<32x128xf32>
    %20 = tpu.matmul %18, %19, %cst_12 {dimension_numbers = #tpu.dot_dimension_numbers<[1], [0], [0], [1], [0, 0, 1, 1], [], []>} : vector<32x128xbf16>, vector<128x128xbf16>, vector<32x128xf32> -> vector<32x128xf32>
    %21 = vector.extract_strided_slice %2 {offsets = [2, 0], sizes = [1, 128], strides = [1, 1]} : vector<4x128xf32> to vector<1x128xf32>
    %22 = vector.broadcast %21 : vector<1x128xf32> to vector<32x128xf32>
    %23 = arith.addf %20, %22 : vector<32x128xf32>
    %24 = arith.addf %23, %1 : vector<32x128xf32>
    %cst_13 = arith.constant 0.000000e+00 : f32
    %25 = vector.broadcast %cst_13 : f32 to vector<32x128xf32>
    %26 = arith.maximumf %24, %25 : vector<32x128xf32>
    %27 = arith.truncf %26 : vector<32x128xf32> to vector<32x128xbf16>
    %c0_14 = arith.constant 0 : index
    %c0_15 = arith.constant 0 : index
    %28 = vector.load %arg6[%c0_14, %c0_15] : memref<128x128xbf16, #tpu.memory_space<vmem>>, vector<128x128xbf16>
    %cst_16 = arith.constant dense<0.000000e+00> : vector<32x128xf32>
    %29 = tpu.matmul %27, %28, %cst_16 {dimension_numbers = #tpu.dot_dimension_numbers<[1], [0], [0], [1], [0, 0, 1, 1], [], []>} : vector<32x128xbf16>, vector<128x128xbf16>, vector<32x128xf32> -> vector<32x128xf32>
    %30 = vector.extract_strided_slice %2 {offsets = [3, 0], sizes = [1, 128], strides = [1, 1]} : vector<4x128xf32> to vector<1x128xf32>
    %31 = vector.broadcast %30 : vector<1x128xf32> to vector<32x128xf32>
    %32 = arith.addf %29, %31 : vector<32x128xf32>
    %c0_17 = arith.constant 0 : index
    %c0_18 = arith.constant 0 : index
    %33 = vector.load %arg7[%c0_17, %c0_18] : memref<32x128xf32, #tpu.memory_space<vmem>>, vector<32x128xf32>
    tpu.vector_store %arg7[%c0_17, %c0_18], %32 {strides = array<i32>} : memref<32x128xf32, #tpu.memory_space<vmem>>, vector<32x128xf32>,
    return
  }
  func.func @transform_0(%arg0: i32) -> (i32, i32) {
    %c0_i32 = arith.constant 0 : i32
    %c0_i32_0 = arith.constant 0 : i32
    return %arg0, %c0_i32 : i32, i32
  }
  func.func @transform_1(%arg0: i32) -> (i32, i32) {
    %c0_i32 = arith.constant 0 : i32
    %c0_i32_0 = arith.constant 0 : i32
    %c0_i32_1 = arith.constant 0 : i32
    return %c0_i32, %c0_i32_0 : i32, i32
  }
  func.func @transform_2(%arg0: i32) -> (i32, i32) {
    %c0_i32 = arith.constant 0 : i32
    %c0_i32_0 = arith.constant 0 : i32
    %c0_i32_1 = arith.constant 0 : i32
    return %c0_i32, %c0_i32_0 : i32, i32
  }
  func.func @transform_3(%arg0: i32) -> (i32, i32) {
    %c0_i32 = arith.constant 0 : i32
    %c0_i32_0 = arith.constant 0 : i32
    %c0_i32_1 = arith.constant 0 : i32
    return %c0_i32, %c0_i32_0 : i32, i32
  }
  func.func @transform_4(%arg0: i32) -> (i32, i32) {
    %c0_i32 = arith.constant 0 : i32
    %c0_i32_0 = arith.constant 0 : i32
    %c0_i32_1 = arith.constant 0 : i32
    return %c0_i32, %c0_i32_0 : i32, i32
  }
  func.func @transform_5(%arg0: i32) -> (i32, i32) {
    %c0_i32 = arith.constant 0 : i32
    %c0_i32_0 = arith.constant 0 : i32
    %c0_i32_1 = arith.constant 0 : i32
    return %c0_i32, %c0_i32_0 : i32, i32
  }
  func.func @transform_6(%arg0: i32) -> (i32, i32) {
    %c0_i32 = arith.constant 0 : i32
    %c0_i32_0 = arith.constant 0 : i32
    return %arg0, %c0_i32 : i32, i32
  }
}

</mosaic_0001>

<bundles_post_ra>
// kernel: tpu_custom_call.1
= control target key start
LH: loop header
LB: loop body
LE: loop exit
PB: predicated region body
PF: predicated region fallthrough
CT: control target
= control target key end

     0   :  { %11 = vsyncpa [#allocation3], 0  ;;  %s1674_s0 = inlined_call_operand.hbm [shape: bf16[64,128], index: 0, kind: input, shape index: {}]   ;;  %s1675_s1 = inlined_call_operand.hbm [shape: f32[4,128], index: 1, kind: input, shape index: {}]   ;;  %s1676_s2 = inlined_call_operand.hbm [shape: bf16[128,128], index: 2, kind: input, shape index: {}]   ;;  %s1677_s3 = inlined_call_operand.hbm [shape: bf16[128,128], index: 3, kind: input, shape index: {}]   ;;  %s1678_s4 = inlined_call_operand.hbm [shape: bf16[128,128], index: 4, kind: input, shape index: {}]   ;;  %s1679_s5 = inlined_call_operand.hbm [shape: bf16[128,128], index: 5, kind: input, shape index: {}]   ;;  %s1680_s6 = inlined_call_operand.hbm [shape: f32[64,128], index: 6, kind: output, shape index: {}]  }
   0x1   :  { %13 = vsyncpa [#allocation3 + $0x1], 0 }
   0x2   :  { %14 = vsyncpa [#allocation6], 0 }
   0x3   :  { %15 = vsyncpa [#allocation9], 0 }
   0x4   :  { %16 = vsyncpa [#allocation12], 0 }
   0x5   :  { %17 = vsyncpa [#allocation4], 0 }
   0x6   :  { %19 = vsyncpa [#allocation4 + $0x1], 0  ;;  %s1476_s21 = smov 0   ;;  %s1478_s22 = smov 0  }
   0x7   :  { %s1480_s23 = smov 0   ;;  %s1482_s24 = smov 0  }
   0x8 LB: > { %s199_s27 = sshll.u32 %s1675_s1, 4  ;;  %s1500_s28 = sadd.s32 4294967295, %s1430_s24   ;;  %s1430_s24 = sphi %s1482_s24, %s1695_s24   ;;  %s1426_s23 = sphi %s1480_s23, %s1694_s23   ;;  %s1422_s22 = sphi %s1478_s22, %s1693_s22   ;;  %s1418_s21 = sphi %s1476_s21, %s1692_s21   ;;  %s200_s27 = int_to_ptr.hbm [resolvable:$true] %s199_s27 }
   0x9   : > { %p876_p0 = scmp.ge.s32.totalorder %s1430_s24, 1  ;;  %p46_p1 = scmp.eq.s32.totalorder %s1500_s28, 0 }
   0xa   : > { %p187_p2 = scmp.lt.s32.totalorder %s1430_s24, 3  ;;  %s1432_s30 = smov [#allocation5]  }
   0xb   : > { %s201_s7 = sshll.u32 %s1432_s30, 4  ;;  %s224_s10 = sshll.u32 %s1677_s3, 4  ;;  %s202_s7 = int_to_ptr.vmem [resolvable:$true] %s201_s7  ;;  %s225_s10 = int_to_ptr.hbm [resolvable:$true] %s224_s10 }
   0xc   : > { %p1505_p3 = pnand %p876_p0, %p187_p2  ;;  %s210_s14 = sshll.u32 %s1676_s2, 4  ;;  %s211_s14 = int_to_ptr.hbm [resolvable:$true] %s210_s14 }
   0xd   : > { %s1433_s15 = smov [#allocation8]   ;;  %s1681_s17 = smov 64  }
   0xe   : > { %p1095_p5 = pneg %p1505_p3  ;;  %s226_s16 = sshll.u32 %s1433_s15, 4  ;;  %s227_s16 = int_to_ptr.vmem [resolvable:$true] %s226_s16 }
   0xf   : > { %s1682_s18 = smov 4   ;;  %s238_s25 = sshll.u32 %s1678_s4, 4  ;;  %s239_s25 = int_to_ptr.hbm [resolvable:$true] %s238_s25 }
  0x10   : > { %p1517_p6 = pnand %p1095_p5, %p46_p1  ;;  %s1436_s26 = smov [#allocation7]  }
  0x11   : > { %s212_s30 = sshll.u32 %s1436_s26, 4  ;;  %s1438_s12 = smov [#allocation11]   ;;  %s213_s30 = int_to_ptr.vmem [resolvable:$true] %s212_s30 }
  0x12   : > { %1098 = dma.hbm_to_vmem [thread:$0]  (!%p1517_p6), %s200_s27, 64, %s202_s7, [#allocation6]  }
  0x13   : > { %1104 = dma.hbm_to_vmem [thread:$0]  (!%p1517_p6), %s225_s10, 1024, %s227_s16, [#allocation9], %s1681_s17, %s1681_s17, %s1682_s18  }
  0x14   : > { %1101 = dma.hbm_to_vmem [thread:$0]  (!%p1517_p6), %s211_s14, 1024, %s213_s30, [#allocation6], %s1681_s17, %s1681_s17, %s1682_s18  }
  0x15   : > { %s1437_s27 = smov [#allocation10]   ;;  %s252_s10 = sshll.u32 %s1679_s5, 4  ;;  %s253_s10 = int_to_ptr.hbm [resolvable:$true] %s252_s10 }
  0x16   : > { %s240_s7 = sshll.u32 %s1437_s27, 4  ;;  %s254_s13 = sshll.u32 %s1438_s12, 4  ;;  %s241_s7 = int_to_ptr.vmem [resolvable:$true] %s240_s7  ;;  %s255_s13 = int_to_ptr.vmem [resolvable:$true] %s254_s13 }
  0x17   : > { %1107 = dma.hbm_to_vmem [thread:$0]  (!%p1517_p6), %s239_s25, 1024, %s241_s7, [#allocation9], %s1681_s17, %s1681_s17, %s1682_s18  }
  0x18   : > { %1110 = dma.hbm_to_vmem [thread:$0]  (!%p1517_p6), %s253_s10, 1024, %s255_s13, [#allocation12], %s1681_s17, %s1681_s17, %s1682_s18  }
  0x19   : > { %s875_s14 = sadd.s32 4294967294, %s1430_s24   ;;  %s1554_s15 = sadd.s32 1, %s1430_s24  }
  0x1a   : > { %s32_s16 = sadd.s32 1, %s1426_s23  ;;  %s29_s19 = ssub.s32 %s1430_s24, %s1554_s15 }
  0x1b   : > { %p39_p7 = scmp.ne.s32.totalorder %s1426_s23, %s1422_s22  ;;  %p30_p8 = scmp.eq.s32.totalorder %s29_s19, 0 }
  0x1c   : > { %p40_p9 = scmp.eq.s32.totalorder %s1430_s24, 0  ;;  %p45_p10 = scmp.ne.s32.totalorder %s1422_s22, %s1418_s21 }
  0x1d   : > { %p174_p11 = scmp.eq.s32.totalorder %s1500_s28, 1  ;;  %p180_p0 = scmp.eq.s32.totalorder %s875_s14, 1 }
  0x1e   : > { %s1566_s20 = scalar_select %p30_p8, %s1426_s23, %s32_s16  }
  0x1f   : > { %p1570_p12 = por %p46_p1, %p45_p10  ;;  %p1574_p13 = por %p174_p11, %p39_p7 }
  0x20   : > { %p41_p2 = por %p40_p9, %p39_p7  ;;  %s268_s26 = sand.u32 1, %s1426_s23  }
  0x21   : > { %p1579_p5 = por %p180_p0, %p45_p10  ;;  %p1124_p6 = scmp.lt.s32.totalorder %s1430_s24, 2 }
  0x22   : > { %s883_s27 = sshll.u32 %s268_s26, 4  ;;  %s1035_s7 = sshll.u32 %s1430_s24, 4 }
  0x23   : > { %s277_s10 = scalar_lea.hbm %s1674_s0, %s1035_s7  ;;  %s272_s13 = scalar_lea.vmem [#allocation2], %s883_s27 }
  0x24   : > { %s278_s12 = sshll.u32 %s277_s10, 4  ;;  %s280_s16 = sshll.u32 %s272_s13, 4  ;;  %s279_s12 = int_to_ptr.hbm [resolvable:$true] %s278_s12  ;;  %s281_s16 = int_to_ptr.vmem [resolvable:$true] %s280_s16 }
  0x25   : > { %p1588_p8 = pnand %p1124_p6, %p41_p2  ;;  %s269_s19 = scalar_lea.sflag [#allocation3], %s268_s26 }
  0x26   : > { %s1322_s17 = sshra.s32 %s279_s12, 4  ;;  %s1329_s27 = scalar_lea.hbm %s1674_s0, 32  ;;  %s1323_s17 = int_to_ptr.hbm [resolvable:$true] %s1322_s17 }
  0x27   : > { %s1324_s18 = scalar_lea.hbm %s1323_s17, 16  ;;  %p1326_p9 = pneg %p1588_p8 }
  0x28   : > { %p1325_p7 = scmp.ne.s32.totalorder %s1323_s17, %s1324_s18  ;;  %p1330_p0 = scmp.lt.s32.totalorder %s1323_s17, %s1674_s0 }
  0x29   : > { %p1331_p2 = scmp.lt.s32.totalorder %s1329_s27, %s1324_s18 }
  0x2a   : > { %p1327_p10 = pnand %p1326_p9, %p1325_p7 }
  0x2b   : > { %p1332_p6 = por %p1331_p2, %p1330_p0 }
  0x2c   : > { %p1328_p11 = pneg %p1327_p10 }
  0x2e   : > { %p1333_p4 = pnand %p1332_p6, %p1328_p11 }
  0x30   : > { %1336 = shalt.err (!%p1333_p4)
}
  0x31   : > { %s1689_s26 = smov 4   ;;  %s1690_s13 = smov 64  }
  0x32   : > { %1114 = dma.hbm_to_vmem [thread:$0]  (!%p1588_p8), %s279_s12, 256, %s281_s16, %s269_s19, %s1690_s13, %s1690_s13, %s1689_s26  }
  0x33   : > { %292 = sbr.rel (%p1505_p3) target bundleno = 685 (0x2ad), region = 44  ;;  %s1608_s7 = sand.u32 (!%p1505_p3), 1, %s1422_s22  }
  0x34   : > { %s887_s17 = sshll.u32 (!%p1505_p3), %s1608_s7, 4  ;;  %s295_s18 = scalar_lea.sflag (!%p1505_p3), [#allocation3], %s1608_s7 }
  0x35   : > { %s1612_s8 = scalar_lea.vmem (!%p1505_p3), [#allocation2], %s887_s17 }
  0x38   : > { %1397 = dma.done.wait (%p1570_p12), %s295_s18, 256  }
  0x39   : > { %1399 = vsyncadd (%p1570_p12), %s295_s18, 4294967040 }
  0x3a   : > { %1401 = dma.done.wait (%p46_p1), [#allocation6], 1088  }
  0x3b   : > { %1403 = vsyncadd (%p46_p1), [#allocation6], 4294966208 }
  0x3c   : > { %1405 = dma.done.wait (%p46_p1), [#allocation9], 2048  }
  0x3d   : > { %1407 = vsyncadd (%p46_p1), [#allocation9], 4294965248 }
  0x3e   : > { %1409 = dma.done.wait (%p46_p1), [#allocation12], 1024  }
  0x3f   : > { %1411 = vsyncadd (%p46_p1), [#allocation12], 4294966272  ;;  %v1045_v0 = vld [vmem:[#allocation7 + $0x38] sm:$0xff]  ;;  %v1044_v1 = vld [vmem:[#allocation7 + $0x30] sm:$0xff]  ;;  %s893_s29 = sshll.u32 %s1608_s7, 5  ;;  %s1070_s12 = sshll.u32 %s1500_s28, 5 }
  0x40   : > { %441 = vmatpush.bf16.msra.mxu0 %v1045_v0  ;;  %v1043_v2 = vld [vmem:[#allocation7 + $0x28] sm:$0xff]  ;;  %v1042_v3 = vld [vmem:[#allocation7 + $0x20] sm:$0xff]  ;;  %v1041_v4 = vld [vmem:[#allocation7 + $0x18] sm:$0xff]  ;;  %s352_s11 = scalar_lea.vmem [#allocation13], %s893_s29  ;;  %s750_s19 = scalar_lea.hbm %s1680_s6, %s1070_s12 }
  0x41   : > { %v1053_v5 = vld [vmem:[#allocation8 + $0x38] sm:$0xff]  ;;  %v1040_v6 = vld [vmem:[#allocation7 + $0x10] sm:$0xff]  ;;  %v1039_v8 = vld [vmem:[#allocation7 + $0x8] sm:$0xff]  ;;  %s751_s27 = sshll.u32 %s352_s11, 4  ;;  %s753_s9 = sshll.u32 %s750_s19, 4  ;;  %s752_s27 = int_to_ptr.vmem [resolvable:$true] %s751_s27  ;;  %s754_s9 = int_to_ptr.hbm [resolvable:$true] %s753_s9 }
  0x42   : > { %531 = vmatpush.bf16.msra.mxu1 %v1053_v5  ;;  %v1052_v7 = vld [vmem:[#allocation8 + $0x30] sm:$0xff]  ;;  %v1051_v9 = vld [vmem:[#allocation8 + $0x28] sm:$0xff]  ;;  %v1038_v10 = vld [vmem:[#allocation7] sm:$0xff]  ;;  %s739_s10 = scalar_lea.sflag [#allocation4], %s1608_s7  ;;  %s1366_s26 = sshra.s32 %s754_s9, 4  ;;  %s1367_s26 = int_to_ptr.hbm [resolvable:$true] %s1366_s26 }
  0x43   : > { %v1050_v11 = vld [vmem:[#allocation8 + $0x20] sm:$0xff]  ;;  %v1049_v14 = vld [vmem:[#allocation8 + $0x18] sm:$0xff]  ;;  %v1048_v15 = vld [vmem:[#allocation8 + $0x10] sm:$0xff]  ;;  %s1368_s13 = scalar_lea.hbm %s1367_s26, 32  ;;  %s1372_s18 = scalar_lea.hbm %s1680_s6, 64 }
  0x44   : > { %442 = vmatpush.bf16.msra.mxu0 %v1044_v1  ;;  %v1036_v12 = vld [vmem:[%s1612_s8] sm:$0xff]  ;;  %v1037_v13 = vld [vmem:[%s1612_s8 + $0x8] sm:$0xff]  ;;  %p1369_p1 = scmp.ne.s32.totalorder %s1367_s26, %s1368_s13  ;;  %p1373_p12 = scmp.lt.s32.totalorder %s1367_s26, %s1680_s6 }
  0x45   : > { %v1047_v16 = vld [vmem:[#allocation8 + $0x8] sm:$0xff]  ;;  %v1046_v17 = vld [vmem:[#allocation8] sm:$0xff]  ;;  %v1061_v18 = vld [vmem:[#allocation10 + $0x38] sm:$0xff]  ;;  %p1374_p8 = scmp.lt.s32.totalorder %s1372_s18, %s1368_s13 }
  0x46   : > { %532 = vmatpush.bf16.msra.mxu1 %v1052_v7  ;;  %v1632_v19 = vld [vmem:[#allocation5] sm:$0xf]  ;;  %621 = vmatpush.bf16.msra.mxu2 %v1061_v18  ;;  %v1060_v21 = vld [vmem:[#allocation10 + $0x30] sm:$0xff]  ;;  %v1059_v23 = vld [vmem:[#allocation10 + $0x28] sm:$0xff]  ;;  %p1370_p3 = pnand %p1369_p1, %p1574_p13 }
  0x47   : > { %v380_v22 = vperm.slane %v1632_v19, 0  ;;  %v1058_v27 = vld [vmem:[#allocation10 + $0x20] sm:$0xff]  ;;  %v1057_v38 = vld [vmem:[#allocation10 + $0x18] sm:$0xff]  ;;  %v1056_v39 = vld [vmem:[#allocation10 + $0x10] sm:$0xff]  ;;  %v482_v45 = vperm.slane %v1632_v19, 1  ;;  %p1375_p7 = por %p1374_p8, %p1373_p12 }
  0x48   : > { %443 = vmatpush.bf16.msra.mxu0 %v1043_v2  ;;  %v1055_v40 = vld [vmem:[#allocation10 + $0x8] sm:$0xff]  ;;  %v1054_v41 = vld [vmem:[#allocation10] sm:$0xff]  ;;  %v1069_v42 = vld [vmem:[#allocation11 + $0x38] sm:$0xff]  ;;  %v572_v2 = vperm.slane %v1632_v19, 2  ;;  %p1371_p4 = pneg %p1370_p3 }
  0x49   : > { %715 = vmatpush.bf16.msra.mxu3 %v1069_v42  ;;  %v1068_v44 = vld [vmem:[#allocation11 + $0x30] sm:$0xff]  ;;  %v1067_v46 = vld [vmem:[#allocation11 + $0x28] sm:$0xff]  ;;  %v1066_v50 = vld [vmem:[#allocation11 + $0x20] sm:$0xff] }
  0x4a   : > { %533 = vmatpush.bf16.msra.mxu1 %v1051_v9  ;;  %622 = vmatpush.bf16.msra.mxu2 %v1060_v21  ;;  %v1065_v61 = vld [vmem:[#allocation11 + $0x18] sm:$0xff]  ;;  %v1064_v62 = vld [vmem:[#allocation11 + $0x10] sm:$0xff]  ;;  %v1063_v63 = vld [vmem:[#allocation11 + $0x8] sm:$0xff]  ;;  %p1376_p9 = pnand %p1375_p7, %p1371_p4 }
  0x4b   : > { %v1062_v0 = vld [vmem:[#allocation11] sm:$0xff] }
  0x4c   : > { %444 = vmatpush.bf16.msra.mxu0 %v1042_v3  ;;  %v355_v3 = vld [vmem:[%s1612_s8] sm:$0xff]  }
  0x4d   : > { %716 = vmatpush.bf16.msra.mxu3 %v1068_v44 }
  0x4e   : > { %534 = vmatpush.bf16.msra.mxu1 %v1050_v11  ;;  %623 = vmatpush.bf16.msra.mxu2 %v1059_v23 }
  0x50   : > { %445 = vmatpush.bf16.msra.mxu0 %v1041_v4  ;;  %v359_v4 = vunpack.c.l.bf16 %v355_v3 }
  0x51   : > { %717 = vmatpush.bf16.msra.mxu3 %v1067_v46 }
  0x52   : > { %535 = vmatpush.bf16.msra.mxu1 %v1049_v14  ;;  %624 = vmatpush.bf16.msra.mxu2 %v1058_v27  ;;  %v666_v27 = vperm.slane %v1632_v19, 3 }
  0x54   : > { %446 = vmatpush.bf16.msra.mxu0 %v1040_v6  ;;  %v360_v6 = vunpack.c.h.bf16 %v355_v3 }
  0x55   : > { %718 = vmatpush.bf16.msra.mxu3 %v1066_v50 }
  0x56   : > { %536 = vmatpush.bf16.msra.mxu1 %v1048_v15  ;;  %625 = vmatpush.bf16.msra.mxu2 %v1057_v38  ;;  %v357_v15 = vld [vmem:[%s1612_s8 + $0x8] sm:$0xff]  }
  0x57   : > { %v362_v18 = vunpack.c.h.bf16 %v357_v15 }
  0x58   : > { %447 = vmatpush.bf16.msra.mxu0 %v1039_v8 }
  0x59   : > { %719 = vmatpush.bf16.msra.mxu3 %v1065_v61 }
  0x5a   : > { %537 = vmatpush.bf16.msra.mxu1 %v1047_v16  ;;  %626 = vmatpush.bf16.msra.mxu2 %v1056_v39  ;;  %v361_v16 = vunpack.c.l.bf16 %v357_v15 }
  0x5c   : > { %448 = vmatpush.bf16.msra.mxu0 %v1038_v10 }
  0x5d   : > { %720 = vmatpush.bf16.msra.mxu3 %v1064_v62 }
  0x5e   : > { %538 = vmatpush.bf16.msra.mxu1 %v1046_v17  ;;  %627 = vmatpush.bf16.msra.mxu2 %v1055_v40 }
  0x5f   : > { %449 = vmatmul.bf16.vlgmr.msra.gmra.mxu0 %v1036_v12 }
  0x61   : > { %721 = vmatpush.bf16.msra.mxu3 %v1063_v63 }
  0x62   : > { %628 = vmatpush.bf16.msra.mxu2 %v1054_v41 }
  0x65   : > { %722 = vmatpush.bf16.msra.mxu3 %v1062_v0 }
  0x6f   : > { %454 = vmatmul.bf16.gmra.mxu0 %v1037_v13 }
  0xdc   : > { %v450_v20 = vpop.f32.mrf.mxu0 }
  0xdd   : > { %v451_v24 = vadd.f32 %v450_v20, %v380_v22 }
  0xdf   : > { %v460_v28 = vmax.f32 %v451_v24, 0.0 }
  0xe4   : > { %v452_v25 = vpop.f32.mrf.mxu0 }
  0xe5   : > { %v453_v26 = vadd.f32 %v452_v25, %v380_v22 }
  0xe7   : > { %v461_v29 = vmax.f32 %v453_v26, 0.0 }
  0xe9   : > { %v464_v30 = vpack.c.bf16 %v461_v29, %v460_v28 }
  0xeb   : > { %539 = vmatmul.bf16.vlgmr.msra.gmra.mxu1 %v464_v30 }
  0xec   : > { %v455_v31 = vpop.f32.mrf.mxu0 }
  0xed   : > { %v456_v32 = vadd.f32 %v455_v31, %v380_v22 }
  0xef   : > { %v462_v35 = vmax.f32 %v456_v32, 0.0 }
  0xf4   : > { %v457_v33 = vpop.f32.mrf.mxu0 }
  0xf5   : > { %v458_v34 = vadd.f32 %v457_v33, %v380_v22 }
  0xf7   : > { %v463_v36 = vmax.f32 %v458_v34, 0.0 }
  0xf9   : > { %v465_v37 = vpack.c.bf16 %v463_v36, %v462_v35 }
  0xfb   : > { %544 = vmatmul.bf16.gmra.mxu1 %v465_v37 }
 0x168   : > { %v540_v43 = vpop.f32.mrf.mxu1 }
 0x169   : > { %v541_v47 = vadd.f32 %v540_v43, %v482_v45 }
 0x16b   : > { %v550_v51 = vmax.f32 %v541_v47, 0.0 }
 0x170   : > { %v542_v48 = vpop.f32.mrf.mxu1 }
 0x171   : > { %v543_v49 = vadd.f32 %v542_v48, %v482_v45 }
 0x173   : > { %v551_v52 = vmax.f32 %v543_v49, 0.0 }
 0x175   : > { %v554_v53 = vpack.c.bf16 %v551_v52, %v550_v51 }
 0x177   : > { %629 = vmatmul.bf16.vlgmr.msra.gmra.mxu2 %v554_v53 }
 0x178   : > { %v545_v54 = vpop.f32.mrf.mxu1 }
 0x179   : > { %v546_v55 = vadd.f32 %v545_v54, %v482_v45 }
 0x17b   : > { %v552_v58 = vmax.f32 %v546_v55, 0.0 }
 0x180   : > { %v547_v56 = vpop.f32.mrf.mxu1 }
 0x181   : > { %v548_v57 = vadd.f32 %v547_v56, %v482_v45 }
 0x183   : > { %v553_v59 = vmax.f32 %v548_v57, 0.0 }
 0x185   : > { %v555_v60 = vpack.c.bf16 %v553_v59, %v552_v58 }
 0x187   : > { %634 = vmatmul.bf16.gmra.mxu2 %v555_v60 }
 0x1fa   : > { %v630_v1 = vpop.f32.mrf.mxu2 }
 0x1fb   : > { %v631_v5 = vadd.f32 %v630_v1, %v572_v2 }
 0x1fd   : > { %v640_v8 = vadd.f32 %v631_v5, %v359_v4 }
 0x1ff   : > { %v644_v11 = vmax.f32 %v640_v8, 0.0 }
 0x202   : > { %v632_v7 = vpop.f32.mrf.mxu2 }
 0x203   : > { %v633_v9 = vadd.f32 %v632_v7, %v572_v2 }
 0x205   : > { %v641_v10 = vadd.f32 %v633_v9, %v360_v6 }
 0x207   : > { %v645_v12 = vmax.f32 %v641_v10, 0.0 }
 0x209   : > { %v648_v13 = vpack.c.bf16 %v645_v12, %v644_v11 }
 0x20a   : > { %v635_v14 = vpop.f32.mrf.mxu2 }
 0x20b   : > { %723 = vmatmul.bf16.vlgmr.msra.gmra.mxu3 %v648_v13  ;;  %v636_v17 = vadd.f32 %v635_v14, %v572_v2 }
 0x20d   : > { %v642_v21 = vadd.f32 %v636_v17, %v361_v16 }
 0x20f   : > { %v646_v24 = vmax.f32 %v642_v21, 0.0 }
 0x212   : > { %v637_v20 = vpop.f32.mrf.mxu2 }
 0x213   : > { %v638_v22 = vadd.f32 %v637_v20, %v572_v2 }
 0x215   : > { %v643_v23 = vadd.f32 %v638_v22, %v362_v18 }
 0x217   : > { %v647_v25 = vmax.f32 %v643_v23, 0.0 }
 0x219   : > { %v649_v26 = vpack.c.bf16 %v647_v25, %v646_v24 }
 0x21b   : > { %728 = vmatmul.bf16.gmra.mxu3 %v649_v26 }
 0x28e   : > { %v724_v28 = vpop.f32.mrf.mxu3 }
 0x28f   : > { %v725_v29 = vadd.f32 %v724_v28, %v666_v27 }
 0x291   : > { %734 = vst [vmem:[%s352_s11] sm:$0xff] %v725_v29 }
 0x296   : > { %v726_v30 = vpop.f32.mrf.mxu3 }
 0x297   : > { %v727_v31 = vadd.f32 %v726_v30, %v666_v27 }
 0x299   : > { %735 = vst [vmem:[%s352_s11 + $0x8] sm:$0xff] %v727_v31 }
 0x29e   : > { %v729_v32 = vpop.f32.mrf.mxu3 }
 0x29f   : > { %v730_v33 = vadd.f32 %v729_v32, %v666_v27 }
 0x2a1   : > { %736 = vst [vmem:[%s352_s11 + $0x10] sm:$0xff] %v730_v33 }
 0x2a6   : > { %v731_v19 = vpop.f32.mrf.mxu3 }
 0x2a7   : > { %v732_v34 = vadd.f32 %v731_v19, %v666_v27 }
 0x2a9   : > { %737 = vst [vmem:[%s352_s11 + $0x18] sm:$0xff] %v732_v34 }
 0x2aa   : > { %1379 = shalt.err (!%p1376_p9)
}
 0x2ab   : > { %s1439_s7 = smov 128   ;;  %s1440_s11 = smov 8  }
 0x2ac   : > { %1093 = dma.vmem_to_hbm [thread:$0]  (%p1574_p13), %s752_s27, 512, %s754_s9, %s739_s10, %s1439_s7, %s1439_s7, %s1440_s11  }
 0x2ad PF: > { %s768_s12 = sand.u32 1, %s1418_s21   ;;  %p1691_p10 = scmp.ge.s32.totalorder %s1430_s24, 2 }
 0x2ae   : > { %s769_s16 = scalar_lea.sflag [#allocation4], %s768_s12 }
 0x2af   : > { %p1116_p11 = pnand %p1691_p10, %p1579_p5 }
 0x2b1   : > { %p1117_p0 = pneg %p1116_p11 }
 0x2b3   : > { %1413 = dma.done.wait (%p1117_p0), %s769_s16, 512  }
 0x2b4   : > { %1415 = vsyncadd (%p1117_p0), %s769_s16, 4294966784  ;;  %p22_p2 = scmp.ge.s32.totalorder %s1554_s15, 4   ;;  %s1692_s21 = smov %s1422_s22 }
 0x2b5   : > { %s1693_s22 = smov %s1426_s23  ;;  %s1694_s23 = smov %s1566_s20 }
 0x2b6   : > { %s1695_s24 = smov %s1554_s15  ;;  %24 = sbr.rel (!%p22_p2) target bundleno = 8 (0x8), region = 109 }
 0x2bb   :  { %775 = vsyncpa [#allocation3], 1 }
 0x2bc   :  { %777 = vsyncpa [#allocation3 + $0x1], 1 }
 0x2bd   :  { %778 = vsyncpa [#allocation6], 1 }
 0x2be   :  { %779 = vsyncpa [#allocation9], 1 }
 0x2bf   :  { %780 = vsyncpa [#allocation12], 1 }
 0x2c0   :  { %781 = vsyncpa [#allocation4], 1 }
 0x2c1   :  { %783 = vsyncpa [#allocation4 + $0x1], 1 }

</bundles_post_ra>
